<compile_context>
chip_gen: v7x
topology: tpu7x:2x2x1
jax: 0.10.0
libtpu: 0.0.40
codegen_flags: <defaults>
</compile_context>

<pallas_src>
import jax
import jax.numpy as jnp
from jax.experimental import pallas as pl
from jax.experimental.pallas import tpu as pltpu

STATE_DIM = 2        # Config.STATE_DIMENSION for MountainCar-v0
NUM_ACTIONS = 3      # Config.NUM_ACTIONS for MountainCar-v0
DIMS = [STATE_DIM, 32, 64, 32, NUM_ACTIONS]
NUM_LAYERS = len(DIMS) - 1

LANE = 128           # pad every feature dim to 128 lanes
SUBLANE = 8          # pad batch to a multiple of 8 sublanes
BLOCK_B = 256        # batch rows per grid step (>=256 to feed the 256-wide MXU)


def dqn_fused_kernel(x_ref, w_ref, b_ref, q_ref, qa_ref, act_ref):
    """Whole MLP + greedy argmax/gather epilogue in one kernel invocation."""
    h = x_ref[...]                                           # (blk, 128) f32
    for i in range(NUM_LAYERS - 1):
        h = jnp.dot(h.astype(jnp.bfloat16), w_ref[i],
                    preferred_element_type=jnp.float32) + b_ref[i]
        h = jnp.maximum(h, 0.0)
    q = jnp.dot(h.astype(jnp.bfloat16), w_ref[NUM_LAYERS - 1],
                preferred_element_type=jnp.float32) + b_ref[NUM_LAYERS - 1]
    q_ref[...] = q

    # Fused greedy epilogue: argmax over the first NUM_ACTIONS lanes + gather.
    lane = jax.lax.broadcasted_iota(jnp.int32, q.shape, 1)
    valid = lane < NUM_ACTIONS
    qm = jnp.where(valid, q, -jnp.inf)
    q_max = jnp.max(qm, axis=1, keepdims=True)                       # (blk, 1)
    is_max = jnp.logical_and(qm == q_max, valid)
    act = jnp.min(jnp.where(is_max, lane, LANE), axis=1, keepdims=True)  # first max
    # Lane-dense (blk, 128) outputs to avoid masked partial stores.
    qa_ref[...] = jnp.broadcast_to(q_max, qa_ref.shape)
    act_ref[...] = jnp.broadcast_to(act, act_ref.shape)


def init_params(key):
    """PyTorch Linear default init U(-1/sqrt(fan_in), 1/sqrt(fan_in)).

    Weights stored as (in_features, out_features)."""
    params = []
    for i in range(NUM_LAYERS):
        fan_in, fan_out = DIMS[i], DIMS[i + 1]
        key, kw, kb = jax.random.split(key, 3)
        bound = 1.0 / jnp.sqrt(float(fan_in))
        w = jax.random.uniform(kw, (fan_in, fan_out), jnp.float32, -bound, bound)
        b = jax.random.uniform(kb, (fan_out,), jnp.float32, -bound, bound)
        params.append((w, b))
    return params


def pack_params(params):
    """Pad + stack parameters ONCE: (L,128,128) bf16 weights, (L,1,128) f32 biases."""
    w_stack = jnp.zeros((NUM_LAYERS, LANE, LANE), jnp.float32)
    b_stack = jnp.zeros((NUM_LAYERS, 1, LANE), jnp.float32)
    for i, (w, b) in enumerate(params):
        w_stack = w_stack.at[i, :w.shape[0], :w.shape[1]].set(w)
        b_stack = b_stack.at[i, 0, :b.shape[0]].set(b)
    return w_stack.astype(jnp.bfloat16), b_stack


@jax.jit
def dqn_apply(x, w_stack, b_stack):
    """Runs the fused Pallas kernel.

    Returns (qs (batch, NUM_ACTIONS) f32, greedy_q (batch,) f32, greedy_act (batch,) i32).
    """
    batch = x.shape[0]
    if batch <= BLOCK_B:
        blk = ((batch + SUBLANE - 1) // SUBLANE) * SUBLANE
        bpad = blk
    else:
        blk = BLOCK_B
        bpad = ((batch + blk - 1) // blk) * blk

    x_p = jnp.pad(x.astype(jnp.float32),
                  ((0, bpad - batch), (0, LANE - STATE_DIM)))

    q_p, qa_p, act_p = pl.pallas_call(
        dqn_fused_kernel,
        grid=(bpad // blk,),
        out_shape=(
            jax.ShapeDtypeStruct((bpad, LANE), jnp.float32),
            jax.ShapeDtypeStruct((bpad, LANE), jnp.float32),
            jax.ShapeDtypeStruct((bpad, LANE), jnp.int32),
        ),
        in_specs=[
            pl.BlockSpec((blk, LANE), lambda i: (i, 0)),
            pl.BlockSpec((NUM_LAYERS, LANE, LANE), lambda i: (0, 0, 0)),
            pl.BlockSpec((NUM_LAYERS, 1, LANE), lambda i: (0, 0, 0)),
        ],
        out_specs=(
            pl.BlockSpec((blk, LANE), lambda i: (i, 0)),
            pl.BlockSpec((blk, LANE), lambda i: (i, 0)),
            pl.BlockSpec((blk, LANE), lambda i: (i, 0)),
        ),
        compiler_params=pltpu.CompilerParams(
            dimension_semantics=("parallel",)),
    )(x_p, w_stack, b_stack)

    return (q_p[:batch, :NUM_ACTIONS],
            qa_p[:batch, 0],
            act_p[:batch, 0])


def dqn_forward(x, w_stack, b_stack, actions=None, eps=None):
    """Mirrors DQN.forward: returns (chosen_q, actions)."""
    qs, greedy_q, greedy_act = dqn_apply(x, w_stack, b_stack)
    if actions is not None:
        batch = qs.shape[0]
        return qs[jnp.arange(batch), actions], actions
    if eps is not None and eps > 0:
        # TODO(synk): eps-greedy sampling uses host-side np.random.choice in the
        # original; stochastic action sampling is left out of the kernel path
        # (greedy only).
        pass
    return greedy_q, greedy_act


if __name__ == "__main__":
    key = jax.random.PRNGKey(0)
    pkey, xkey, akey = jax.random.split(key, 3)

    params = init_params(pkey)
    w_stack, b_stack = pack_params(params)

    batch = 4
    x = jax.random.normal(xkey, (batch, STATE_DIM), jnp.float32)

    # Greedy path (actions=None, eps=None) — fully fused in the kernel.
    chosen_q, actions = dqn_forward(x, w_stack, b_stack)
    chosen_q = jax.block_until_ready(chosen_q)
    actions = jax.block_until_ready(actions)

    # Provided-actions path (uses the kernel's full q output + one gather).
    given_actions = jax.random.randint(akey, (batch,), 0, NUM_ACTIONS)
    q_given, _ = dqn_forward(x, w_stack, b_stack, actions=given_actions)
    q_given = jax.block_until_ready(q_given)

    # Pure-JAX f32 reference of the same MLP.
    def ref_mlp(xv, ps):
        h = xv
        for i, (w, b) in enumerate(ps):
            h = h @ w + b
            if i < len(ps) - 1:
                h = jnp.maximum(h, 0.0)
        return h

    qs_k, qa_k, act_k = dqn_apply(x, w_stack, b_stack)
    qs_ref = ref_mlp(x, params)

    # bf16 MXU operands => compare against the f32 reference with loose tolerance.
    assert jnp.allclose(qs_k, qs_ref, atol=5e-2, rtol=5e-2), "q mismatch vs f32 reference"
    # Fused epilogue must be self-consistent with the emitted q values.
    assert jnp.array_equal(act_k, jnp.argmax(qs_k, axis=1).astype(jnp.int32)), \
        "fused argmax mismatch"
    assert jnp.allclose(qa_k, qs_k[jnp.arange(batch), act_k], atol=1e-6), \
        "fused chosen-q mismatch"
    assert chosen_q.shape == (batch,) and actions.shape == (batch,)
    assert q_given.shape == (batch,)

    print("KERNEL_OK")
</pallas_src>

<mosaic_0001>
module attributes {stable_mosaic.version = 11 : i64} {
  func.func @dqn_fused_kernel(%arg0: i32, %arg1: memref<8x128xf32, #tpu.memory_space<vmem>>, %arg2: memref<4x128x128xbf16, #tpu.memory_space<vmem>>, %arg3: memref<4x1x128xf32, #tpu.memory_space<vmem>>, %arg4: memref<8x128xf32, #tpu.memory_space<vmem>>, %arg5: memref<8x128xf32, #tpu.memory_space<vmem>>, %arg6: memref<8x128xi32, #tpu.memory_space<vmem>>) attributes {dimension_semantics = [#tpu.dimension_semantics<parallel>], iteration_bounds = array<i64: 1>, scalar_prefetch = 0 : i64, scratch_operands = 0 : i64, tpu.core_type = #tpu.core_type<tc>, window_params = [{transform_indices = @transform_0, window_bounds = array<i64: 8, 128>}, {pipeline_mode = #tpu.pipeline_mode<synchronous>, transform_indices = @transform_1, window_bounds = array<i64: 4, 128, 128>}, {pipeline_mode = #tpu.pipeline_mode<synchronous>, transform_indices = @transform_2, window_bounds = array<i64: 4, 1, 128>}, {transform_indices = @transform_3, window_bounds = array<i64: 8, 128>}, {transform_indices = @transform_4, window_bounds = array<i64: 8, 128>}, {transform_indices = @transform_5, window_bounds = array<i64: 8, 128>}]} {
    %c0 = arith.constant 0 : index
    %c0_0 = arith.constant 0 : index
    %0 = vector.load %arg1[%c0, %c0_0] : memref<8x128xf32, #tpu.memory_space<vmem>>, vector<8x128xf32>
    %1 = arith.truncf %0 : vector<8x128xf32> to vector<8x128xbf16>
    %c0_1 = arith.constant 0 : index
    %c0_2 = arith.constant 0 : index
    %c0_3 = arith.constant 0 : index
    %2 = vector.load %arg2[%c0_1, %c0_2, %c0_3] : memref<4x128x128xbf16, #tpu.memory_space<vmem>>, vector<1x128x128xbf16>
    %3 = vector.shape_cast %2 : vector<1x128x128xbf16> to vector<128x128xbf16>
    %cst = arith.constant dense<0.000000e+00> : vector<8x128xf32>
    %4 = tpu.matmul %1, %3, %cst {dimension_numbers = #tpu.dot_dimension_numbers<[1], [0], [0], [1], [0, 0, 1, 1], [], []>} : vector<8x128xbf16>, vector<128x128xbf16>, vector<8x128xf32> -> vector<8x128xf32>
    %c0_4 = arith.constant 0 : index
    %c0_5 = arith.constant 0 : index
    %c0_6 = arith.constant 0 : index
    %5 = vector.load %arg3[%c0_4, %c0_5, %c0_6] : memref<4x1x128xf32, #tpu.memory_space<vmem>>, vector<1x1x128xf32>
    %6 = vector.shape_cast %5 : vector<1x1x128xf32> to vector<1x128xf32>
    %7 = vector.broadcast %6 : vector<1x128xf32> to vector<8x128xf32>
    %8 = arith.addf %4, %7 : vector<8x128xf32>
    %cst_7 = arith.constant 0.000000e+00 : f32
    %9 = vector.broadcast %cst_7 : f32 to vector<8x128xf32>
    %10 = arith.maximumf %8, %9 : vector<8x128xf32>
    %11 = arith.truncf %10 : vector<8x128xf32> to vector<8x128xbf16>
    %c1 = arith.constant 1 : index
    %c0_8 = arith.constant 0 : index
    %c0_9 = arith.constant 0 : index
    %12 = vector.load %arg2[%c1, %c0_8, %c0_9] : memref<4x128x128xbf16, #tpu.memory_space<vmem>>, vector<1x128x128xbf16>
    %13 = vector.shape_cast %12 : vector<1x128x128xbf16> to vector<128x128xbf16>
    %cst_10 = arith.constant dense<0.000000e+00> : vector<8x128xf32>
    %14 = tpu.matmul %11, %13, %cst_10 {dimension_numbers = #tpu.dot_dimension_numbers<[1], [0], [0], [1], [0, 0, 1, 1], [], []>} : vector<8x128xbf16>, vector<128x128xbf16>, vector<8x128xf32> -> vector<8x128xf32>
    %c1_11 = arith.constant 1 : index
    %c0_12 = arith.constant 0 : index
    %c0_13 = arith.constant 0 : index
    %15 = vector.load %arg3[%c1_11, %c0_12, %c0_13] : memref<4x1x128xf32, #tpu.memory_space<vmem>>, vector<1x1x128xf32>
    %16 = vector.shape_cast %15 : vector<1x1x128xf32> to vector<1x128xf32>
    %17 = vector.broadcast %16 : vector<1x128xf32> to vector<8x128xf32>
    %18 = arith.addf %14, %17 : vector<8x128xf32>
    %cst_14 = arith.constant 0.000000e+00 : f32
    %19 = vector.broadcast %cst_14 : f32 to vector<8x128xf32>
    %20 = arith.maximumf %18, %19 : vector<8x128xf32>
    %21 = arith.truncf %20 : vector<8x128xf32> to vector<8x128xbf16>
    %c2 = arith.constant 2 : index
    %c0_15 = arith.constant 0 : index
    %c0_16 = arith.constant 0 : index
    %22 = vector.load %arg2[%c2, %c0_15, %c0_16] : memref<4x128x128xbf16, #tpu.memory_space<vmem>>, vector<1x128x128xbf16>
    %23 = vector.shape_cast %22 : vector<1x128x128xbf16> to vector<128x128xbf16>
    %cst_17 = arith.constant dense<0.000000e+00> : vector<8x128xf32>
    %24 = tpu.matmul %21, %23, %cst_17 {dimension_numbers = #tpu.dot_dimension_numbers<[1], [0], [0], [1], [0, 0, 1, 1], [], []>} : vector<8x128xbf16>, vector<128x128xbf16>, vector<8x128xf32> -> vector<8x128xf32>
    %c2_18 = arith.constant 2 : index
    %c0_19 = arith.constant 0 : index
    %c0_20 = arith.constant 0 : index
    %25 = vector.load %arg3[%c2_18, %c0_19, %c0_20] : memref<4x1x128xf32, #tpu.memory_space<vmem>>, vector<1x1x128xf32>
    %26 = vector.shape_cast %25 : vector<1x1x128xf32> to vector<1x128xf32>
    %27 = vector.broadcast %26 : vector<1x128xf32> to vector<8x128xf32>
    %28 = arith.addf %24, %27 : vector<8x128xf32>
    %cst_21 = arith.constant 0.000000e+00 : f32
    %29 = vector.broadcast %cst_21 : f32 to vector<8x128xf32>
    %30 = arith.maximumf %28, %29 : vector<8x128xf32>
    %31 = arith.truncf %30 : vector<8x128xf32> to vector<8x128xbf16>
    %c3 = arith.constant 3 : index
    %c0_22 = arith.constant 0 : index
    %c0_23 = arith.constant 0 : index
    %32 = vector.load %arg2[%c3, %c0_22, %c0_23] : memref<4x128x128xbf16, #tpu.memory_space<vmem>>, vector<1x128x128xbf16>
    %33 = vector.shape_cast %32 : vector<1x128x128xbf16> to vector<128x128xbf16>
    %cst_24 = arith.constant dense<0.000000e+00> : vector<8x128xf32>
    %34 = tpu.matmul %31, %33, %cst_24 {dimension_numbers = #tpu.dot_dimension_numbers<[1], [0], [0], [1], [0, 0, 1, 1], [], []>} : vector<8x128xbf16>, vector<128x128xbf16>, vector<8x128xf32> -> vector<8x128xf32>
    %c3_25 = arith.constant 3 : index
    %c0_26 = arith.constant 0 : index
    %c0_27 = arith.constant 0 : index
    %35 = vector.load %arg3[%c3_25, %c0_26, %c0_27] : memref<4x1x128xf32, #tpu.memory_space<vmem>>, vector<1x1x128xf32>
    %36 = vector.shape_cast %35 : vector<1x1x128xf32> to vector<1x128xf32>
    %37 = vector.broadcast %36 : vector<1x128xf32> to vector<8x128xf32>
    %38 = arith.addf %34, %37 : vector<8x128xf32>
    %c0_28 = arith.constant 0 : index
    %c0_29 = arith.constant 0 : index
    %39 = vector.load %arg4[%c0_28, %c0_29] : memref<8x128xf32, #tpu.memory_space<vmem>>, vector<8x128xf32>
    tpu.vector_store %arg4[%c0_28, %c0_29], %38 {strides = array<i32>} : memref<8x128xf32, #tpu.memory_space<vmem>>, vector<8x128xf32>,
    %40 = tpu.iota {dimensions = array<i32: 1>} : vector<8x128xi32>
    %c3_i32 = arith.constant 3 : i32
    %41 = vector.broadcast %c3_i32 : i32 to vector<8x128xi32>
    %42 = arith.cmpi slt, %40, %41 : vector<8x128xi32>
    %cst_30 = arith.constant 0xFF800000 : f32
    %43 = vector.broadcast %cst_30 : f32 to vector<8x128xf32>
    %44 = arith.select %42, %38, %43 : vector<8x128xi1>, vector<8x128xf32>
    %cst_31 = arith.constant dense<0xFF800000> : vector<8xf32>
    %45 = vector.multi_reduction <maximumf>, %44, %cst_31 [1] : vector<8x128xf32> to vector<8xf32>
    %46 = vector.shape_cast %45 : vector<8xf32> to vector<8x1xf32>
    %47 = vector.broadcast %46 : vector<8x1xf32> to vector<8x128xf32>
    %48 = arith.cmpf oeq, %44, %47 : vector<8x128xf32>
    %49 = arith.andi %48, %42 : vector<8x128xi1>
    %c128_i32 = arith.constant 128 : i32
    %50 = vector.broadcast %c128_i32 : i32 to vector<8x128xi32>
    %51 = arith.select %49, %40, %50 : vector<8x128xi1>, vector<8x128xi32>
    %cst_32 = arith.constant dense<2147483647> : vector<8xi32>
    %52 = vector.multi_reduction <minsi>, %51, %cst_32 [1] : vector<8x128xi32> to vector<8xi32>
    %53 = vector.shape_cast %52 : vector<8xi32> to vector<8x1xi32>
    %54 = vector.shape_cast %46 : vector<8x1xf32> to vector<8x1xf32>
    %55 = vector.broadcast %54 : vector<8x1xf32> to vector<8x128xf32>
    %c0_33 = arith.constant 0 : index
    %c0_34 = arith.constant 0 : index
    %56 = vector.load %arg5[%c0_33, %c0_34] : memref<8x128xf32, #tpu.memory_space<vmem>>, vector<8x128xf32>
    tpu.vector_store %arg5[%c0_33, %c0_34], %55 {strides = array<i32>} : memref<8x128xf32, #tpu.memory_space<vmem>>, vector<8x128xf32>,
    %57 = vector.shape_cast %53 : vector<8x1xi32> to vector<8x1xi32>
    %58 = vector.broadcast %57 : vector<8x1xi32> to vector<8x128xi32>
    %c0_35 = arith.constant 0 : index
    %c0_36 = arith.constant 0 : index
    %59 = vector.load %arg6[%c0_35, %c0_36] : memref<8x128xi32, #tpu.memory_space<vmem>>, vector<8x128xi32>
    tpu.vector_store %arg6[%c0_35, %c0_36], %58 {strides = array<i32>} : memref<8x128xi32, #tpu.memory_space<vmem>>, vector<8x128xi32>,
    return
  }
  func.func @transform_0(%arg0: i32) -> (i32, i32) {
    %c0_i32 = arith.constant 0 : i32
    %c0_i32_0 = arith.constant 0 : i32
    return %arg0, %c0_i32 : i32, i32
  }
  func.func @transform_1(%arg0: i32) -> (i32, i32, i32) {
    %c0_i32 = arith.constant 0 : i32
    %c0_i32_0 = arith.constant 0 : i32
    %c0_i32_1 = arith.constant 0 : i32
    %c0_i32_2 = arith.constant 0 : i32
    return %c0_i32, %c0_i32_0, %c0_i32_1 : i32, i32, i32
  }
  func.func @transform_2(%arg0: i32) -> (i32, i32, i32) {
    %c0_i32 = arith.constant 0 : i32
    %c0_i32_0 = arith.constant 0 : i32
    %c0_i32_1 = arith.constant 0 : i32
    %c0_i32_2 = arith.constant 0 : i32
    return %c0_i32, %c0_i32_0, %c0_i32_1 : i32, i32, i32
  }
  func.func @transform_3(%arg0: i32) -> (i32, i32) {
    %c0_i32 = arith.constant 0 : i32
    %c0_i32_0 = arith.constant 0 : i32
    return %arg0, %c0_i32 : i32, i32
  }
  func.func @transform_4(%arg0: i32) -> (i32, i32) {
    %c0_i32 = arith.constant 0 : i32
    %c0_i32_0 = arith.constant 0 : i32
    return %arg0, %c0_i32 : i32, i32
  }
  func.func @transform_5(%arg0: i32) -> (i32, i32) {
    %c0_i32 = arith.constant 0 : i32
    %c0_i32_0 = arith.constant 0 : i32
    return %arg0, %c0_i32 : i32, i32
  }
}

</mosaic_0001>

<bundles_post_ra>
// kernel: dqn_apply.1
= control target key start
LH: loop header
LB: loop body
LE: loop exit
PB: predicated region body
PF: predicated region fallthrough
CT: control target
= control target key end

     0   :  { %11 = vsyncpa [#allocation3], 0  ;;  %s745_s18 = smov [#allocation2]   ;;  %s856_s0 = inlined_call_operand.vmem [shape: f32[8,128], index: 0, kind: input, shape index: {}]   ;;  %s857_s1 = inlined_call_operand.hbm [shape: bf16[4,128,128], index: 1, kind: input, shape index: {}]   ;;  %s858_s2 = inlined_call_operand.vmem [shape: f32[4,1,128], index: 2, kind: input, shape index: {}]   ;;  %s859_s3 = inlined_call_operand.vmem [shape: f32[8,128], index: 3, kind: output, shape index: {0}]   ;;  %s860_s4 = inlined_call_operand.vmem [shape: f32[8,128], index: 4, kind: output, shape index: {1}]   ;;  %s861_s5 = inlined_call_operand.vmem [shape: s32[8,128], index: 5, kind: output, shape index: {2}]  }
   0x1   :  { %s19_s19 = sshll.u32 %s745_s18, 4  ;;  %s721_s22 = scalar_lea.hbm %s857_s1, 4096  ;;  %s20_s19 = int_to_ptr.vmem [resolvable:$true] %s19_s19 }
   0x2   :  { %p722_p0 = scmp.ne.s32.totalorder %s857_s1, %s721_s22  ;;  %p725_p1 = scmp.lt.u32.totalorder %s721_s22, %s857_s1 }
   0x4   :  { %p727_p2 = pnand %p725_p1, %p722_p0 }
   0x6   :  { %730 = shalt.err (!%p727_p2)
}
   0x7   :  { %s731_s27 = scalar_lea.vmem %s20_s19, 4096  ;;  %p736_p4 = scmp.lt.s32.totalorder %s20_s19, %s20_s19 }
   0x8   :  { %p732_p3 = scmp.ne.s32.totalorder %s20_s19, %s731_s27  ;;  %p737_p5 = scmp.lt.s32.totalorder %s731_s27, %s731_s27 }
   0xa   :  { %p738_p6 = por %p737_p5, %p736_p4 }
   0xc   :  { %p739_p7 = pnand %p738_p6, %p732_p3 }
   0xe   :  { %742 = shalt.err (!%p739_p7)
}
   0xf   :  { %s746_s28 = smov 64   ;;  %s747_s29 = smov 4  }
  0x10   :  { %25 = dma.hbm_to_vmem [thread:$0]  %s857_s1, 4096, %s20_s19, [#allocation3], %s746_s28, %s746_s28, %s747_s29  }
  0x11   :  { %743 = dma.done.wait [#allocation3], 4096  }
  0x12   :  { %744 = vsyncadd [#allocation3], 4294963200  ;;  %v748_v0 = vmov 0.0   ;;  %vm749_vm0 = vmmov 0   ;;  %v689_v1 = vld [vmem:[#allocation2] sm:$0xff]   ;;  %v690_v2 = vld [vmem:[#allocation2 + $0x8] sm:$0xff]   ;;  %v491_v59 = vlaneseq }
  0x13   :  { %604 = vmatprep.subr.bf16.mxu0 %v748_v0  ;;  %620 = vmatprep.mubr.msk.bf16.mxu0 %vm749_vm0, %v748_v0  ;;  %v691_v3 = vld [vmem:[#allocation2 + $0x10] sm:$0xff]   ;;  %v697_v4 = vld [vmem:[#allocation2 + $0x40] sm:$0xff]   ;;  %v692_v5 = vld [vmem:[#allocation2 + $0x18] sm:$0xff]  }
  0x14   :  { %624 = vmatprep.subr.bf16.mxu1 %v748_v0  ;;  %640 = vmatprep.mubr.msk.bf16.mxu1 %vm749_vm0, %v748_v0  ;;  %v698_v6 = vld [vmem:[#allocation2 + $0x48] sm:$0xff]   ;;  %v693_v7 = vld [vmem:[#allocation2 + $0x20] sm:$0xff]   ;;  %v699_v8 = vld [vmem:[#allocation2 + $0x50] sm:$0xff]   ;;  %v492_v60 = vand.u32 127, %v491_v59 }
  0x15   :  { %605 = vmatpush3.bf16.msra.mxu0 %v689_v1  ;;  %625 = vmatpush3.bf16.msra.mxu1 %v697_v4  ;;  %v694_v9 = vld [vmem:[#allocation2 + $0x28] sm:$0xff]   ;;  %v700_v10 = vld [vmem:[#allocation2 + $0x58] sm:$0xff]   ;;  %v695_v11 = vld [vmem:[#allocation2 + $0x30] sm:$0xff]  }
  0x16   :  { %606 = vmatprep.subr.bf16.mxu0 %v748_v0  ;;  %626 = vmatprep.subr.bf16.mxu1 %v748_v0  ;;  %v701_v12 = vld [vmem:[#allocation2 + $0x60] sm:$0xff]   ;;  %v696_v13 = vld [vmem:[#allocation2 + $0x38] sm:$0xff]   ;;  %v702_v15 = vld [vmem:[#allocation2 + $0x68] sm:$0xff]   ;;  %vm493_vm1 = vcmp.lt.s32.totalorder %v492_v60, 3 }
  0x17   :  { %v32_v14 = vld [vmem:[%s856_s0] sm:$0xff]  ;;  %v703_v17 = vld [vmem:[#allocation2 + $0x70] sm:$0xff]   ;;  %v704_v18 = vld [vmem:[#allocation2 + $0x78] sm:$0xff]  }
  0x18   :  { %v33_v16 = vpack.c.bf16 %v32_v14, %v32_v14  ;;  %v705_v19 = vld [vmem:[#allocation2 + $0x80] sm:$0xff]   ;;  %v706_v20 = vld [vmem:[#allocation2 + $0x88] sm:$0xff]   ;;  %v707_v21 = vld [vmem:[#allocation2 + $0x90] sm:$0xff]  }
  0x19   :  { %607 = vmatpush3.bf16.msra.mxu0 %v690_v2  ;;  %627 = vmatpush3.bf16.msra.mxu1 %v698_v6  ;;  %v708_v22 = vld [vmem:[#allocation2 + $0x98] sm:$0xff]   ;;  %v709_v23 = vld [vmem:[#allocation2 + $0xa0] sm:$0xff]   ;;  %v710_v24 = vld [vmem:[#allocation2 + $0xa8] sm:$0xff]  }
  0x1a   :  { %608 = vmatprep.subr.bf16.mxu0 %v748_v0  ;;  %628 = vmatprep.subr.bf16.mxu1 %v748_v0  ;;  %v529_v25 = vld [vmem:[%s858_s2] ss:$0 sm:$0xff]  ;;  %v711_v33 = vld [vmem:[#allocation2 + $0xb0] sm:$0xff]   ;;  %v712_v34 = vld [vmem:[#allocation2 + $0xb8] sm:$0xff]  }
  0x1b   :  { %v713_v35 = vld [vmem:[#allocation2 + $0xc0] sm:$0xff]   ;;  %v714_v36 = vld [vmem:[#allocation2 + $0xc8] sm:$0xff]   ;;  %v715_v37 = vld [vmem:[#allocation2 + $0xd0] sm:$0xff]  }
  0x1c   :  { %v716_v38 = vld [vmem:[#allocation2 + $0xd8] sm:$0xff]   ;;  %v717_v39 = vld [vmem:[#allocation2 + $0xe0] sm:$0xff]   ;;  %v718_v40 = vld [vmem:[#allocation2 + $0xe8] sm:$0xff]  }
  0x1d   :  { %609 = vmatpush3.bf16.msra.mxu0 %v691_v3  ;;  %629 = vmatpush3.bf16.msra.mxu1 %v699_v8  ;;  %v539_v41 = vld [vmem:[%s858_s2 + $0x1] ss:$0 sm:$0xff]  ;;  %v719_v49 = vld [vmem:[#allocation2 + $0xf0] sm:$0xff]   ;;  %v720_v50 = vld [vmem:[#allocation2 + $0xf8] sm:$0xff]  }
  0x1e   :  { %610 = vmatprep.subr.bf16.mxu0 %v748_v0  ;;  %630 = vmatprep.subr.bf16.mxu1 %v748_v0  ;;  %v549_v51 = vld [vmem:[%s858_s2 + $0x2] ss:$0 sm:$0xff]  ;;  %v559_v61 = vld [vmem:[%s858_s2 + $0x3] ss:$0 sm:$0xff] }
  0x21   :  { %611 = vmatpush3.bf16.msra.mxu0 %v692_v5  ;;  %631 = vmatpush3.bf16.msra.mxu1 %v700_v10 }
  0x22   :  { %612 = vmatprep.subr.bf16.mxu0 %v748_v0  ;;  %632 = vmatprep.subr.bf16.mxu1 %v748_v0 }
  0x25   :  { %613 = vmatpush3.bf16.msra.mxu0 %v693_v7  ;;  %633 = vmatpush3.bf16.msra.mxu1 %v701_v12 }
  0x26   :  { %614 = vmatprep.subr.bf16.mxu0 %v748_v0  ;;  %634 = vmatprep.subr.bf16.mxu1 %v748_v0 }
  0x29   :  { %615 = vmatpush3.bf16.msra.mxu0 %v694_v9  ;;  %635 = vmatpush3.bf16.msra.mxu1 %v702_v15 }
  0x2a   :  { %616 = vmatprep.subr.bf16.mxu0 %v748_v0  ;;  %636 = vmatprep.subr.bf16.mxu1 %v748_v0 }
  0x2d   :  { %617 = vmatpush3.bf16.msra.mxu0 %v695_v11  ;;  %637 = vmatpush3.bf16.msra.mxu1 %v703_v17 }
  0x2e   :  { %618 = vmatprep.subr.bf16.mxu0 %v748_v0  ;;  %638 = vmatprep.subr.bf16.mxu1 %v748_v0 }
  0x31   :  { %619 = vmatpush3.bf16.msra.mxu0 %v696_v13  ;;  %639 = vmatpush3.bf16.msra.mxu1 %v704_v18 }
  0x32   :  { %644 = vmatprep.subr.bf16.mxu0 %v748_v0  ;;  %664 = vmatprep.subr.bf16.mxu1 %v748_v0 }
  0x34   :  { %621 = vmatmul.mubr.bf16.vlgmr.msra.gmra.mrb[0].mxu0 %v33_v16 }
  0x35   :  { %660 = vmatprep.mubr.msk.bf16.mxu0 %vm749_vm0, %v748_v0  ;;  %645 = vmatpush3.bf16.msra.mxu0 %v705_v19 }
  0x36   :  { %646 = vmatprep.subr.bf16.mxu0 %v748_v0 }
  0x39   :  { %647 = vmatpush3.bf16.msra.mxu0 %v706_v20 }
  0x3a   :  { %648 = vmatprep.subr.bf16.mxu0 %v748_v0 }
  0x3d   :  { %649 = vmatpush3.bf16.msra.mxu0 %v707_v21 }
  0x3e   :  { %650 = vmatprep.subr.bf16.mxu0 %v748_v0 }
  0x41   :  { %651 = vmatpush3.bf16.msra.mxu0 %v708_v22 }
  0x42   :  { %652 = vmatprep.subr.bf16.mxu0 %v748_v0 }
  0x45   :  { %653 = vmatpush3.bf16.msra.mxu0 %v709_v23 }
  0x46   :  { %654 = vmatprep.subr.bf16.mxu0 %v748_v0 }
  0x49   :  { %655 = vmatpush3.bf16.msra.mxu0 %v710_v24 }
  0x4a   :  { %656 = vmatprep.subr.bf16.mxu0 %v748_v0 }
  0x4d   :  { %657 = vmatpush3.bf16.msra.mxu0 %v711_v33 }
  0x4e   :  { %658 = vmatprep.subr.bf16.mxu0 %v748_v0 }
  0x51   :  { %659 = vmatpush3.bf16.msra.mxu0 %v712_v34 }
 0x107   :  { %v139_v26 = vpop.f32.mrb[0].mxu0 }
 0x108   :  { %v140_v27 = vadd.f32 %v529_v25, %v139_v26  ;;  %v622_v28 = vpop.f32.mrb[1].mxu0 }
 0x109   :  { %v142_v29 = vpop.f32.mrb[2].mxu0 }
 0x10a   :  { %v145_v30 = vmax.f32 %v140_v27, 0.0  ;;  %v623_v31 = vpop.f32.mrb[3].mxu0 }
 0x10c   :  { %v146_v32 = vpack.c.bf16 %v145_v30, %v145_v30 }
 0x10e   :  { %641 = vmatmul.mubr.bf16.vlgmr.msra.gmra.mrb[0].mxu1 %v146_v32 }
 0x10f   :  { %680 = vmatprep.mubr.msk.bf16.mxu1 %vm749_vm0, %v748_v0  ;;  %665 = vmatpush3.bf16.msra.mxu1 %v713_v35 }
 0x110   :  { %666 = vmatprep.subr.bf16.mxu1 %v748_v0 }
 0x113   :  { %667 = vmatpush3.bf16.msra.mxu1 %v714_v36 }
 0x114   :  { %668 = vmatprep.subr.bf16.mxu1 %v748_v0 }
 0x117   :  { %669 = vmatpush3.bf16.msra.mxu1 %v715_v37 }
 0x118   :  { %670 = vmatprep.subr.bf16.mxu1 %v748_v0 }
 0x11b   :  { %671 = vmatpush3.bf16.msra.mxu1 %v716_v38 }
 0x11c   :  { %672 = vmatprep.subr.bf16.mxu1 %v748_v0 }
 0x11f   :  { %673 = vmatpush3.bf16.msra.mxu1 %v717_v39 }
 0x120   :  { %674 = vmatprep.subr.bf16.mxu1 %v748_v0 }
 0x123   :  { %675 = vmatpush3.bf16.msra.mxu1 %v718_v40 }
 0x124   :  { %676 = vmatprep.subr.bf16.mxu1 %v748_v0 }
 0x127   :  { %677 = vmatpush3.bf16.msra.mxu1 %v719_v49 }
 0x128   :  { %678 = vmatprep.subr.bf16.mxu1 %v748_v0 }
 0x12b   :  { %679 = vmatpush3.bf16.msra.mxu1 %v720_v50 }
 0x1e1   :  { %v254_v42 = vpop.f32.mrb[0].mxu1 }
 0x1e2   :  { %v255_v43 = vadd.f32 %v539_v41, %v254_v42  ;;  %v642_v44 = vpop.f32.mrb[1].mxu1 }
 0x1e3   :  { %v257_v45 = vpop.f32.mrb[2].mxu1 }
 0x1e4   :  { %v260_v46 = vmax.f32 %v255_v43, 0.0  ;;  %v643_v47 = vpop.f32.mrb[3].mxu1 }
 0x1e6   :  { %v261_v48 = vpack.c.bf16 %v260_v46, %v260_v46 }
 0x1e8   :  { %661 = vmatmul.mubr.bf16.vlgmr.msra.gmra.mrb[4].mxu0 %v261_v48 }
 0x2bb   :  { %v369_v52 = vpop.f32.mrb[4].mxu0 }
 0x2bc   :  { %v370_v53 = vadd.f32 %v549_v51, %v369_v52  ;;  %v662_v54 = vpop.f32.mrb[5].mxu0 }
 0x2bd   :  { %v372_v55 = vpop.f32.mrb[6].mxu0 }
 0x2be   :  { %v375_v56 = vmax.f32 %v370_v53, 0.0  ;;  %v663_v57 = vpop.f32.mrb[7].mxu0 }
 0x2c0   :  { %v376_v58 = vpack.c.bf16 %v375_v56, %v375_v56 }
 0x2c2   :  { %681 = vmatmul.mubr.bf16.vlgmr.msra.gmra.mrb[4].mxu1 %v376_v58 }
 0x395   :  { %v484_v62 = vpop.f32.mrb[4].mxu1 }
 0x396   :  { %v485_v63 = vadd.f32 %v559_v61, %v484_v62  ;;  %v682_v0 = vpop.f32.mrb[5].mxu1 }
 0x397   :  { %v487_v1 = vpop.f32.mrb[6].mxu1 }
 0x398   :  { %490 = vst [vmem:[%s859_s3] sm:$0xff] %v485_v63  ;;  %v683_v2 = vpop.f32.mrb[7].mxu1  ;;  %v494_v3 = vsel %vm493_vm1, %v485_v63, -inf }
 0x399   :  { %495 = vmax.xlane.f32.xlu0 %v494_v3 }
 0x426   :  { %v496_v4 = vpop.xlane.xlu0 %495 }
 0x427   :  { %vm497_vm2 = vcmp.eq.f32.partialorder %v494_v3, %v496_v4  ;;  %514 = vst [vmem:[%s860_s4] sm:$0xff] %v496_v4 }
 0x428   :  { %vm498_vm3 = vmand %vm497_vm2, %vm493_vm1 }
 0x429   :  { %v499_v5 = vsel %vm498_vm3, %v492_v60, 128 }
 0x42a   :  { %v501_v6 = vshra.s32 %v499_v5, 16  ;;  %v500_v8 = vand.u32 65535, %v499_v5 }
 0x42c   :  { %v503_v7 = vcvt.s32.f32 %v501_v6  ;;  %v502_v10 = vcvt.s32.f32 %v500_v8 }
 0x42e   :  { %504 = vmin.xlane.f32.xlu0 %v503_v7 }
 0x4bb   :  { %v505_v9 = vpop.xlane.xlu0 %504 }
 0x4bc   :  { %vm506_vm4 = vcmp.eq.f32.partialorder %v503_v7, %v505_v9  ;;  %v511_v12 = vcvt.f32.s32 %v505_v9 }
 0x4bd   :  { %v507_v11 = vsel %vm506_vm4, %v502_v10, inf }
 0x4be   :  { %508 = vmin.xlane.f32.xlu1 %v507_v11  ;;  %v512_v14 = vshll.u32 %v511_v12, 16 }
 0x54b   :  { %v509_v13 = vpop.xlane.xlu1 %508 }
 0x54c   :  { %v510_v15 = vcvt.f32.s32 %v509_v13 }
 0x54e   :  { %v513_v16 = vadd.s32 %v512_v14, %v510_v15 }
 0x550   :  { %515 = vst [vmem:[%s861_s5] sm:$0xff] %v513_v16 }
 0x551   :  { %528 = vsyncpa [#allocation3], 1 }

</bundles_post_ra>
